<compile_context>
chip_gen: v5e
topology: v5e:2x2
jax: 0.10.0
libtpu: 0.0.40
codegen_flags: <defaults>
</compile_context>

<pallas_src>
import jax
import jax.numpy as jnp
from jax.experimental import pallas as pl
from jax.experimental.pallas import tpu as pltpu

_BN_EPS = 1e-5
_VMEM_BUDGET = 40 << 20   # tile-sizing budget (safe on v7x's 64 MiB VMEM / TC)
_VMEM_LIMIT = 48 << 20    # scoped VMEM limit handed to Mosaic

# Row layout of the packed small-parameter slab (8, num_feat).
_ROW_BF, _ROW_GAMMA, _ROW_BETA, _ROW_WC, _ROW_BC = 0, 1, 2, 3, 4


# -----------------------------------------------------------------------------
# Fused kernel: K-tiled feature matmul (bf16 operands, f32 acc) + bias + ReLU
#               + BatchNorm1d (train-mode batch stats) + Linear(num_feat, 1)
#               folded into a lane reduction.
# Grid: (K_pad // tk,) -- single "arbitrary" reduction axis.
# -----------------------------------------------------------------------------
def _fused_kernel(x_ref, wf_ref, pack_ref, o_ref, acc_ref):
    k = pl.program_id(0)

    @pl.when(k == 0)
    def _init():
        acc_ref[...] = jnp.zeros_like(acc_ref)

    # MXU: x cast to bf16 in-kernel (no extra HBM pass), f32 accumulation into
    # the resident VMEM scratch.
    acc_ref[...] += jnp.dot(
        x_ref[...].astype(jnp.bfloat16), wf_ref[...],
        preferred_element_type=jnp.float32,
    )

    @pl.when(k == pl.num_programs(0) - 1)
    def _finalize():
        bf    = pack_ref[_ROW_BF:_ROW_BF + 1, :]        # (1, F)
        gamma = pack_ref[_ROW_GAMMA:_ROW_GAMMA + 1, :]  # (1, F)
        beta  = pack_ref[_ROW_BETA:_ROW_BETA + 1, :]    # (1, F)
        wc    = pack_ref[_ROW_WC:_ROW_WC + 1, :]        # (1, F)
        bc    = pack_ref[_ROW_BC:_ROW_BC + 1, 0:1]      # (1, 1)

        # Feature stand-in epilogue (f32): bias + ReLU.
        f = jnp.maximum(acc_ref[...] + bf, 0.0)          # (N, F)
        inv_n = 1.0 / f.shape[0]

        # BatchNorm1d train-mode stats in one pass (sum & sum-of-squares),
        # variance clamped at 0 against cancellation.
        s1 = jnp.sum(f, axis=0, keepdims=True)           # (1, F)
        s2 = jnp.sum(f * f, axis=0, keepdims=True)       # (1, F)
        mean = s1 * inv_n
        var = jnp.maximum(s2 * inv_n - mean * mean, 0.0)
        scale = gamma * jax.lax.rsqrt(var + _BN_EPS)     # (1, F)

        # Fold BN affine into the classifier row:
        #   BN(f) @ wc + bc == sum(f * (wc*scale), -1) + sum((beta-mean*scale)*wc) + bc
        wv = wc * scale                                  # (1, F)
        b_eff = jnp.sum((beta - mean * scale) * wc, axis=-1, keepdims=True) + bc  # (1,1)

        # Linear(num_feat, 1) as an XLU lane reduction.
        o_ref[...] = jnp.sum(f * wv, axis=-1, keepdims=True) + b_eff


# -----------------------------------------------------------------------------
# K-tile sizing: single step when it fits the VMEM budget, else the largest
# 128-multiple tile under budget (K axis zero-padded -> exact result).
# -----------------------------------------------------------------------------
def _choose_k_tiling(in_dim, num_feat, batch, budget_bytes):
    fixed = (batch * num_feat * 4        # f32 accumulator scratch
             + 2 * 8 * num_feat * 4      # packed params (double-buffered)
             + 2 * batch * 128 * 4)      # output tile (lane-padded), dbl-buffered
    per_k = 2 * (batch * 4 + num_feat * 2)   # dbl-buffered f32 x + bf16 wf per K elem
    tk_max = max((budget_bytes - fixed) // per_k, 128)
    if in_dim <= tk_max:
        return in_dim, in_dim            # one step, blocks = full dims, no padding
    tk = max((tk_max // 128) * 128, 128)
    in_dim_pad = pl.cdiv(in_dim, tk) * tk
    return tk, in_dim_pad


def prepare_params(params, *, batch_size, vmem_budget_bytes=_VMEM_BUDGET):
    """One-time parameter prep: bf16 weight conversion, K padding, small-param pack."""
    in_dim, num_feat = params["wf"].shape
    tk, in_dim_pad = _choose_k_tiling(in_dim, num_feat, batch_size, vmem_budget_bytes)

    wf = params["wf"].astype(jnp.bfloat16)               # persistent bf16 weight
    if in_dim_pad != in_dim:
        wf = jnp.pad(wf, ((0, in_dim_pad - in_dim), (0, 0)))

    pack = jnp.zeros((8, num_feat), jnp.float32)
    pack = pack.at[_ROW_BF, :].set(params["bf"].reshape(num_feat))
    pack = pack.at[_ROW_GAMMA, :].set(params["gamma"].reshape(num_feat))
    pack = pack.at[_ROW_BETA, :].set(params["beta"].reshape(num_feat))
    pack = pack.at[_ROW_WC, :].set(params["wc"].reshape(num_feat))
    pack = pack.at[_ROW_BC, 0].set(params["bc"].reshape(()))

    return {
        "wf": wf, "pack": pack, "tk": tk,
        "in_dim": in_dim, "in_dim_pad": in_dim_pad, "num_feat": num_feat,
    }


def siamese_tuning_forward(x_nchw, prep):
    """Fused forward pass. x_nchw: (N, C, H, W) float32; prep from prepare_params."""
    n = x_nchw.shape[0]
    tk, in_dim, in_dim_pad = prep["tk"], prep["in_dim"], prep["in_dim_pad"]
    num_feat = prep["num_feat"]

    x_flat = x_nchw.reshape(n, -1)                        # == torch .view(N, -1)
    if in_dim_pad != in_dim:
        x_flat = jnp.pad(x_flat, ((0, 0), (0, in_dim_pad - in_dim)))

    grid_k = in_dim_pad // tk
    bytes_accessed = (4 * n * in_dim_pad                  # f32 x
                      + 2 * in_dim_pad * num_feat         # bf16 wf
                      + 4 * 8 * num_feat                  # packed params
                      + 4 * n)                            # output

    out = pl.pallas_call(
        _fused_kernel,
        out_shape=jax.ShapeDtypeStruct((n, 1), jnp.float32),
        grid_spec=pltpu.PrefetchScalarGridSpec(
            num_scalar_prefetch=0,
            grid=(grid_k,),
            in_specs=[
                pl.BlockSpec((n, tk), lambda k: (0, k)),          # x slab (f32)
                pl.BlockSpec((tk, num_feat), lambda k: (k, 0)),   # wf slab (bf16)
                pl.BlockSpec((8, num_feat), lambda k: (0, 0)),    # packed params
            ],
            out_specs=pl.BlockSpec((n, 1), lambda k: (0, 0)),
            scratch_shapes=[pltpu.VMEM((n, num_feat), jnp.float32)],
        ),
        compiler_params=pltpu.CompilerParams(
            dimension_semantics=("arbitrary",),           # K is a reduction axis
            vmem_limit_bytes=_VMEM_LIMIT,
        ),
        cost_estimate=pl.CostEstimate(
            flops=2 * n * in_dim_pad * num_feat + 12 * n * num_feat,
            transcendentals=num_feat,
            bytes_accessed=bytes_accessed,
        ),
    )(x_flat, prep["wf"], prep["pack"])
    return out


# -----------------------------------------------------------------------------
# Pure-JAX reference (same bf16 matmul operands, f32 accumulation + BN math).
# -----------------------------------------------------------------------------
def reference_forward(x_nchw, params):
    n = x_nchw.shape[0]
    xf = x_nchw.reshape(n, -1)
    f = jnp.maximum(
        jnp.dot(xf.astype(jnp.bfloat16), params["wf"].astype(jnp.bfloat16),
                preferred_element_type=jnp.float32) + params["bf"],
        0.0,
    )
    mean = jnp.mean(f, axis=0, keepdims=True)
    var = jnp.mean((f - mean) ** 2, axis=0, keepdims=True)   # biased (train mode)
    y = (f - mean) * jax.lax.rsqrt(var + _BN_EPS) * params["gamma"] + params["beta"]
    return y @ params["wc"] + params["bc"]


if __name__ == "__main__":
    # Small, sublane/lane-friendly shapes (N multiple of 8, num_feat = 128).
    N, C, H, W = 8, 3, 16, 16
    num_feat = 128
    in_dim = C * H * W  # 768

    key = jax.random.PRNGKey(0)
    k_x, k_wf, k_bf, k_wc, k_bc = jax.random.split(key, 5)

    x = jax.random.normal(k_x, (N, C, H, W), dtype=jnp.float32)

    params = {
        # feature stand-in
        "wf": 0.02 * jax.random.normal(k_wf, (in_dim, num_feat), jnp.float32),
        "bf": 0.01 * jax.random.normal(k_bf, (1, num_feat), jnp.float32),
        # BatchNorm1d defaults: gamma = 1, beta = 0 (train-mode batch stats)
        # TODO(synk): running_mean/running_var side-effect updates not modeled.
        "gamma": jnp.ones((1, num_feat), jnp.float32),
        "beta": jnp.zeros((1, num_feat), jnp.float32),
        # Linear(num_feat, 1)
        "wc": 0.05 * jax.random.normal(k_wc, (num_feat, 1), jnp.float32),
        "bc": 0.01 * jax.random.normal(k_bc, (1, 1), jnp.float32),
    }

    prep = prepare_params(params, batch_size=N)   # one-time bf16 convert + pack
    out = siamese_tuning_forward(x, prep)
    out = jax.block_until_ready(out)

    ref = reference_forward(x, params)
    assert out.shape == (N, 1)
    assert jnp.allclose(out, ref, atol=5e-3, rtol=5e-3), "mismatch vs reference"

    print("KERNEL_OK")
</pallas_src>

<mosaic_0001>
module attributes {stable_mosaic.version = 11 : i64} {
  func.func @_fused_kernel(%arg0: i32, %arg1: memref<8x768xf32, #tpu.memory_space<vmem>>, %arg2: memref<768x128xbf16, #tpu.memory_space<vmem>>, %arg3: memref<8x128xf32, #tpu.memory_space<vmem>>, %arg4: memref<8x1xf32, #tpu.memory_space<vmem>>, %arg5: memref<8x128xf32, #tpu.memory_space<vmem>>) attributes {dimension_semantics = [#tpu.dimension_semantics<arbitrary>], iteration_bounds = array<i64: 1>, scalar_prefetch = 0 : i64, scratch_operands = 1 : i64, tpu.core_type = #tpu.core_type<tc>, window_params = [{transform_indices = @transform_0, window_bounds = array<i64: 8, 768>}, {transform_indices = @transform_1, window_bounds = array<i64: 768, 128>}, {pipeline_mode = #tpu.pipeline_mode<synchronous>, transform_indices = @transform_2, window_bounds = array<i64: 8, 128>}, {pipeline_mode = #tpu.pipeline_mode<synchronous>, transform_indices = @transform_3, window_bounds = array<i64: 8, 1>}]} {
    %c0_i32 = arith.constant 0 : i32
    %0 = arith.cmpi eq, %arg0, %c0_i32 : i32
    %1 = arith.extui %0 : i1 to i32
    %c0_i32_0 = arith.constant 0 : i32
    %2 = arith.cmpi ne, %1, %c0_i32_0 : i32
    scf.if %2 {
      %cst_10 = arith.constant 0.000000e+00 : f32
      %13 = vector.broadcast %cst_10 : f32 to vector<8x128xf32>
      %c0_11 = arith.constant 0 : index
      %c0_12 = arith.constant 0 : index
      %14 = vector.load %arg5[%c0_11, %c0_12] : memref<8x128xf32, #tpu.memory_space<vmem>>, vector<8x128xf32>
      tpu.vector_store %arg5[%c0_11, %c0_12], %13 {strides = array<i32>} : memref<8x128xf32, #tpu.memory_space<vmem>>, vector<8x128xf32>,
    } else {
    }
    %c0 = arith.constant 0 : index
    %c0_1 = arith.constant 0 : index
    %3 = vector.load %arg5[%c0, %c0_1] : memref<8x128xf32, #tpu.memory_space<vmem>>, vector<8x128xf32>
    %c0_2 = arith.constant 0 : index
    %c0_3 = arith.constant 0 : index
    %4 = vector.load %arg1[%c0_2, %c0_3] : memref<8x768xf32, #tpu.memory_space<vmem>>, vector<8x768xf32>
    %5 = arith.truncf %4 : vector<8x768xf32> to vector<8x768xbf16>
    %c0_4 = arith.constant 0 : index
    %c0_5 = arith.constant 0 : index
    %6 = vector.load %arg2[%c0_4, %c0_5] : memref<768x128xbf16, #tpu.memory_space<vmem>>, vector<768x128xbf16>
    %cst = arith.constant dense<0.000000e+00> : vector<8x128xf32>
    %7 = tpu.matmul %5, %6, %cst {dimension_numbers = #tpu.dot_dimension_numbers<[1], [0], [0], [1], [0, 0, 1, 1], [], []>} : vector<8x768xbf16>, vector<768x128xbf16>, vector<8x128xf32> -> vector<8x128xf32>
    %8 = arith.addf %3, %7 : vector<8x128xf32>
    %c0_6 = arith.constant 0 : index
    %c0_7 = arith.constant 0 : index
    %9 = vector.load %arg5[%c0_6, %c0_7] : memref<8x128xf32, #tpu.memory_space<vmem>>, vector<8x128xf32>
    tpu.vector_store %arg5[%c0_6, %c0_7], %8 {strides = array<i32>} : memref<8x128xf32, #tpu.memory_space<vmem>>, vector<8x128xf32>,
    %c0_i32_8 = arith.constant 0 : i32
    %10 = arith.cmpi eq, %arg0, %c0_i32_8 : i32
    %11 = arith.extui %10 : i1 to i32
    %c0_i32_9 = arith.constant 0 : i32
    %12 = arith.cmpi ne, %11, %c0_i32_9 : i32
    scf.if %12 {
      %c0_10 = arith.constant 0 : index
      %c0_11 = arith.constant 0 : index
      %13 = vector.load %arg3[%c0_10, %c0_11] : memref<8x128xf32, #tpu.memory_space<vmem>>, vector<1x128xf32>
      %c1 = arith.constant 1 : index
      %c0_12 = arith.constant 0 : index
      %14 = vector.load %arg3[%c1, %c0_12] : memref<8x128xf32, #tpu.memory_space<vmem>>, vector<1x128xf32>
      %c2 = arith.constant 2 : index
      %c0_13 = arith.constant 0 : index
      %15 = vector.load %arg3[%c2, %c0_13] : memref<8x128xf32, #tpu.memory_space<vmem>>, vector<1x128xf32>
      %c3 = arith.constant 3 : index
      %c0_14 = arith.constant 0 : index
      %16 = vector.load %arg3[%c3, %c0_14] : memref<8x128xf32, #tpu.memory_space<vmem>>, vector<1x128xf32>
      %c4 = arith.constant 4 : index
      %c0_15 = arith.constant 0 : index
      %17 = vector.load %arg3[%c4, %c0_15] : memref<8x128xf32, #tpu.memory_space<vmem>>, vector<1x1xf32>
      %c0_16 = arith.constant 0 : index
      %c0_17 = arith.constant 0 : index
      %18 = vector.load %arg5[%c0_16, %c0_17] : memref<8x128xf32, #tpu.memory_space<vmem>>, vector<8x128xf32>
      %19 = vector.broadcast %13 : vector<1x128xf32> to vector<8x128xf32>
      %20 = arith.addf %18, %19 : vector<8x128xf32>
      %cst_18 = arith.constant 0.000000e+00 : f32
      %21 = vector.broadcast %cst_18 : f32 to vector<8x128xf32>
      %22 = arith.maximumf %20, %21 : vector<8x128xf32>
      %cst_19 = arith.constant dense<0.000000e+00> : vector<128xf32>
      %23 = vector.multi_reduction <add>, %22, %cst_19 [0] : vector<8x128xf32> to vector<128xf32>
      %24 = vector.shape_cast %23 : vector<128xf32> to vector<1x128xf32>
      %25 = arith.mulf %22, %22 : vector<8x128xf32>
      %cst_20 = arith.constant dense<0.000000e+00> : vector<128xf32>
      %26 = vector.multi_reduction <add>, %25, %cst_20 [0] : vector<8x128xf32> to vector<128xf32>
      %27 = vector.shape_cast %26 : vector<128xf32> to vector<1x128xf32>
      %cst_21 = arith.constant 1.250000e-01 : f32
      %28 = vector.broadcast %cst_21 : f32 to vector<1x128xf32>
      %29 = arith.mulf %24, %28 : vector<1x128xf32>
      %cst_22 = arith.constant 1.250000e-01 : f32
      %30 = vector.broadcast %cst_22 : f32 to vector<1x128xf32>
      %31 = arith.mulf %27, %30 : vector<1x128xf32>
      %32 = arith.mulf %29, %29 : vector<1x128xf32>
      %33 = arith.subf %31, %32 : vector<1x128xf32>
      %cst_23 = arith.constant 0.000000e+00 : f32
      %34 = vector.broadcast %cst_23 : f32 to vector<1x128xf32>
      %35 = arith.maximumf %33, %34 : vector<1x128xf32>
      %cst_24 = arith.constant 9.99999974E-6 : f32
      %36 = vector.broadcast %cst_24 : f32 to vector<1x128xf32>
      %37 = arith.addf %35, %36 : vector<1x128xf32>
      %38 = math.rsqrt %37 : vector<1x128xf32>
      %39 = arith.mulf %14, %38 : vector<1x128xf32>
      %40 = arith.mulf %16, %39 : vector<1x128xf32>
      %41 = arith.mulf %29, %39 : vector<1x128xf32>
      %42 = arith.subf %15, %41 : vector<1x128xf32>
      %43 = arith.mulf %42, %16 : vector<1x128xf32>
      %cst_25 = arith.constant dense<0.000000e+00> : vector<1xf32>
      %44 = vector.multi_reduction <add>, %43, %cst_25 [1] : vector<1x128xf32> to vector<1xf32>
      %45 = vector.shape_cast %44 : vector<1xf32> to vector<1x1xf32>
      %46 = arith.addf %45, %17 : vector<1x1xf32>
      %47 = vector.broadcast %40 : vector<1x128xf32> to vector<8x128xf32>
      %48 = arith.mulf %22, %47 : vector<8x128xf32>
      %cst_26 = arith.constant dense<0.000000e+00> : vector<8xf32>
      %49 = vector.multi_reduction <add>, %48, %cst_26 [1] : vector<8x128xf32> to vector<8xf32>
      %50 = vector.shape_cast %49 : vector<8xf32> to vector<8x1xf32>
      %51 = vector.broadcast %46 : vector<1x1xf32> to vector<8x1xf32>
      %52 = arith.addf %50, %51 : vector<8x1xf32>
      %c0_27 = arith.constant 0 : index
      %c0_28 = arith.constant 0 : index
      %53 = vector.load %arg4[%c0_27, %c0_28] : memref<8x1xf32, #tpu.memory_space<vmem>>, vector<8x1xf32>
      tpu.vector_store %arg4[%c0_27, %c0_28], %52 {strides = array<i32>} : memref<8x1xf32, #tpu.memory_space<vmem>>, vector<8x1xf32>,
    } else {
    }
    return
  }
  func.func @transform_0(%arg0: i32) -> (i32, i32) {
    %c0_i32 = arith.constant 0 : i32
    %c0_i32_0 = arith.constant 0 : i32
    return %c0_i32, %arg0 : i32, i32
  }
  func.func @transform_1(%arg0: i32) -> (i32, i32) {
    %c0_i32 = arith.constant 0 : i32
    %c0_i32_0 = arith.constant 0 : i32
    return %arg0, %c0_i32 : i32, i32
  }
  func.func @transform_2(%arg0: i32) -> (i32, i32) {
    %c0_i32 = arith.constant 0 : i32
    %c0_i32_0 = arith.constant 0 : i32
    %c0_i32_1 = arith.constant 0 : i32
    return %c0_i32, %c0_i32_0 : i32, i32
  }
  func.func @transform_3(%arg0: i32) -> (i32, i32) {
    %c0_i32 = arith.constant 0 : i32
    %c0_i32_0 = arith.constant 0 : i32
    %c0_i32_1 = arith.constant 0 : i32
    return %c0_i32, %c0_i32_0 : i32, i32
  }
}

</mosaic_0001>

<bundles_post_ra>
// kernel: tpu_custom_call.1
= control target key start
LH: loop header
LB: loop body
LE: loop exit
PB: predicated region body
PF: predicated region fallthrough
CT: control target
= control target key end

     0   :  { %8 = vsyncpa [#allocation4], 0  ;;  %s965_s0 = inlined_call_operand.hbm [shape: f32[8,768], index: 0, kind: input, shape index: {}]   ;;  %s966_s1 = inlined_call_operand.hbm [shape: bf16[768,128], index: 1, kind: input, shape index: {}]   ;;  %s967_s2 = inlined_call_operand.hbm [shape: f32[8,128], index: 2, kind: input, shape index: {}]   ;;  %s968_s3 = inlined_call_operand.vmem [shape: f32[8,1], index: 3, kind: output, shape index: {}]  }
   0x1   :  { %9 = vsyncpa [#allocation6], 0  ;;  %s25_s14 = sshll.u32 %s966_s1, 4  ;;  %s928_s15 = smov [#allocation5]   ;;  %s26_s14 = int_to_ptr.hbm [resolvable:$true] %s25_s14 }
   0x2   :  { %s27_s16 = sshll.u32 %s928_s15, 4  ;;  %s15_s19 = sshll.u32 %s965_s0, 4  ;;  %s28_s16 = int_to_ptr.vmem [resolvable:$true] %s27_s16  ;;  %s16_s19 = int_to_ptr.hbm [resolvable:$true] %s15_s19 }
   0x3   :  { %s929_s20 = smov 64   ;;  %s930_s21 = smov 4  }
   0x4   :  { %33 = dma.hbm_to_vmem [thread:$0]  %s26_s14, 6144, %s28_s16, [#allocation6], %s929_s20, %s929_s20, %s930_s21  }
   0x5   :  { %s931_s22 = smov [#allocation3]   ;;  %s39_s26 = sshll.u32 %s967_s2, 4  ;;  %s40_s26 = int_to_ptr.hbm [resolvable:$true] %s39_s26 }
   0x6   :  { %s17_s23 = sshll.u32 %s931_s22, 4  ;;  %s932_s1 = smov [#allocation7]   ;;  %s18_s23 = int_to_ptr.vmem [resolvable:$true] %s17_s23 }
   0x7   :  { %20 = dma.hbm_to_vmem [thread:$0]  %s16_s19, 768, %s18_s23, [#allocation4]  }
   0x8   :  { %s41_s27 = sshll.u32 %s932_s1, 4  ;;  %s42_s27 = int_to_ptr.vmem [resolvable:$true] %s41_s27 }
   0x9   :  { %44 = dma.hbm_to_vmem [thread:$0]  %s40_s26, 128, %s42_s27, [#allocation6]  }
   0xa   :  { %924 = dma.done.wait [#allocation4], 768  }
   0xb   :  { %925 = vsyncadd [#allocation4], 4294966528 }
   0xc   :  { %926 = dma.done.wait [#allocation6], 6272  }
   0xd   :  { %927 = vsyncadd [#allocation6], 4294961024  ;;  %v803_v0 = vld [vmem:[#allocation5 + $0x38] sm:$0xff]  ;;  %v802_v2 = vld [vmem:[#allocation5 + $0x30] sm:$0xff]  ;;  %vm585_vm3 = vcmask 1040384   ;;  %vm596_vm4 = vcmask 7168  }
   0xe   :  { %v811_v1 = vld [vmem:[#allocation5 + $0x78] sm:$0xff]  ;;  %459 = vmatpush.bf16.msra.mxu0 %v803_v0  ;;  %v810_v3 = vld [vmem:[#allocation5 + $0x70] sm:$0xff]  ;;  %v801_v8 = vld [vmem:[#allocation5 + $0x28] sm:$0xff] }
   0xf   :  { %472 = vmatpush.bf16.msra.mxu1 %v811_v1  ;;  %v819_v4 = vld [vmem:[#allocation5 + $0xb8] sm:$0xff]  ;;  %v818_v6 = vld [vmem:[#allocation5 + $0xb0] sm:$0xff]  ;;  %v809_v9 = vld [vmem:[#allocation5 + $0x68] sm:$0xff] }
  0x10   :  { %v827_v5 = vld [vmem:[#allocation5 + $0xf8] sm:$0xff]  ;;  %485 = vmatpush.bf16.msra.mxu2 %v819_v4  ;;  %v826_v7 = vld [vmem:[#allocation5 + $0xf0] sm:$0xff]  ;;  %v817_v10 = vld [vmem:[#allocation5 + $0xa8] sm:$0xff] }
  0x11   :  { %498 = vmatpush.bf16.msra.mxu3 %v827_v5  ;;  %v825_v11 = vld [vmem:[#allocation5 + $0xe8] sm:$0xff]  ;;  %v800_v12 = vld [vmem:[#allocation5 + $0x20] sm:$0xff]  ;;  %v799_v16 = vld [vmem:[#allocation5 + $0x18] sm:$0xff] }
  0x12   :  { %460 = vmatpush.bf16.msra.mxu0 %v802_v2  ;;  %v808_v13 = vld [vmem:[#allocation5 + $0x60] sm:$0xff]  ;;  %v807_v17 = vld [vmem:[#allocation5 + $0x58] sm:$0xff]  ;;  %v798_v20 = vld [vmem:[#allocation5 + $0x10] sm:$0xff] }
  0x13   :  { %473 = vmatpush.bf16.msra.mxu1 %v810_v3  ;;  %v816_v14 = vld [vmem:[#allocation5 + $0xa0] sm:$0xff]  ;;  %v815_v18 = vld [vmem:[#allocation5 + $0x98] sm:$0xff]  ;;  %v806_v21 = vld [vmem:[#allocation5 + $0x50] sm:$0xff] }
  0x14   :  { %486 = vmatpush.bf16.msra.mxu2 %v818_v6  ;;  %v824_v15 = vld [vmem:[#allocation5 + $0xe0] sm:$0xff]  ;;  %v823_v19 = vld [vmem:[#allocation5 + $0xd8] sm:$0xff]  ;;  %v814_v22 = vld [vmem:[#allocation5 + $0x90] sm:$0xff] }
  0x15   :  { %499 = vmatpush.bf16.msra.mxu3 %v826_v7  ;;  %v822_v23 = vld [vmem:[#allocation5 + $0xd0] sm:$0xff]  ;;  %v797_v24 = vld [vmem:[#allocation5 + $0x8] sm:$0xff]  ;;  %v796_v28 = vld [vmem:[#allocation5] sm:$0xff] }
  0x16   :  { %461 = vmatpush.bf16.msra.mxu0 %v801_v8  ;;  %v805_v25 = vld [vmem:[#allocation5 + $0x48] sm:$0xff]  ;;  %v804_v29 = vld [vmem:[#allocation5 + $0x40] sm:$0xff]  ;;  %v63_v30 = vld [vmem:[#allocation3] sm:$0xff] }
  0x17   :  { %474 = vmatpush.bf16.msra.mxu1 %v809_v9  ;;  %v813_v26 = vld [vmem:[#allocation5 + $0x88] sm:$0xff]  ;;  %v64_v31 = vld [vmem:[#allocation3 + $0x8] sm:$0xff]  ;;  %v812_v34 = vld [vmem:[#allocation5 + $0x80] sm:$0xff]  ;;  %v69_v36 = vpack.c.bf16 %v63_v30, %v63_v30 }
  0x18   :  { %487 = vmatpush.bf16.msra.mxu2 %v817_v10  ;;  %v821_v27 = vld [vmem:[#allocation5 + $0xc8] sm:$0xff]  ;;  %v835_v32 = vld [vmem:[#allocation5 + $0x138] sm:$0xff]  ;;  %v820_v35 = vld [vmem:[#allocation5 + $0xc0] sm:$0xff]  ;;  %v70_v37 = vpack.c.bf16 %v64_v31, %v64_v31 }
  0x19   :  { %500 = vmatpush.bf16.msra.mxu3 %v825_v11  ;;  %v843_v33 = vld [vmem:[#allocation5 + $0x178] sm:$0xff]  ;;  %v65_v38 = vld [vmem:[#allocation3 + $0x10] sm:$0xff]  ;;  %v66_v39 = vld [vmem:[#allocation3 + $0x18] sm:$0xff] }
  0x1a   :  { %462 = vmatpush.bf16.msra.mxu0 %v800_v12  ;;  %v834_v40 = vld [vmem:[#allocation5 + $0x130] sm:$0xff]  ;;  %v71_v42 = vpack.c.bf16 %v65_v38, %v65_v38  ;;  %v72_v43 = vpack.c.bf16 %v66_v39, %v66_v39  ;;  %v833_v44 = vld [vmem:[#allocation5 + $0x128] sm:$0xff]  ;;  %v832_v46 = vld [vmem:[#allocation5 + $0x120] sm:$0xff] }
  0x1b   :  { %475 = vmatpush.bf16.msra.mxu1 %v808_v13  ;;  %v842_v41 = vld [vmem:[#allocation5 + $0x170] sm:$0xff]  ;;  %v841_v45 = vld [vmem:[#allocation5 + $0x168] sm:$0xff]  ;;  %v840_v47 = vld [vmem:[#allocation5 + $0x160] sm:$0xff] }
  0x1c   :  { %488 = vmatpush.bf16.msra.mxu2 %v816_v14  ;;  %v831_v48 = vld [vmem:[#allocation5 + $0x118] sm:$0xff]  ;;  %v830_v50 = vld [vmem:[#allocation5 + $0x110] sm:$0xff]  ;;  %v829_v52 = vld [vmem:[#allocation5 + $0x108] sm:$0xff] }
  0x1d   :  { %501 = vmatpush.bf16.msra.mxu3 %v824_v15  ;;  %v839_v49 = vld [vmem:[#allocation5 + $0x158] sm:$0xff]  ;;  %v838_v51 = vld [vmem:[#allocation5 + $0x150] sm:$0xff]  ;;  %v837_v53 = vld [vmem:[#allocation5 + $0x148] sm:$0xff] }
  0x1e   :  { %463 = vmatpush.bf16.msra.mxu0 %v799_v16  ;;  %v828_v54 = vld [vmem:[#allocation5 + $0x100] sm:$0xff]  ;;  %v67_v56 = vld [vmem:[#allocation3 + $0x20] sm:$0xff]  ;;  %v68_v57 = vld [vmem:[#allocation3 + $0x28] sm:$0xff] }
  0x1f   :  { %476 = vmatpush.bf16.msra.mxu1 %v807_v17  ;;  %v836_v55 = vld [vmem:[#allocation5 + $0x140] sm:$0xff]  ;;  %v73_v58 = vpack.c.bf16 %v67_v56, %v67_v56  ;;  %v74_v59 = vpack.c.bf16 %v68_v57, %v68_v57 }
  0x20   :  { %489 = vmatpush.bf16.msra.mxu2 %v815_v18  ;;  %v849_v10 = vld [vmem:[#allocation7] ss:$0 sm:$0xff] }
  0x21   :  { %502 = vmatpush.bf16.msra.mxu3 %v823_v19 }
  0x22   :  { %464 = vmatpush.bf16.msra.mxu0 %v798_v20 }
  0x23   :  { %477 = vmatpush.bf16.msra.mxu1 %v806_v21 }
  0x24   :  { %490 = vmatpush.bf16.msra.mxu2 %v814_v22 }
  0x25   :  { %503 = vmatpush.bf16.msra.mxu3 %v822_v23 }
  0x26   :  { %465 = vmatpush.bf16.msra.mxu0 %v797_v24 }
  0x27   :  { %478 = vmatpush.bf16.msra.mxu1 %v805_v25 }
  0x28   :  { %491 = vmatpush.bf16.msra.mxu2 %v813_v26 }
  0x29   :  { %504 = vmatpush.bf16.msra.mxu3 %v821_v27 }
  0x2a   :  { %466 = vmatpush.bf16.msra.mxu0 %v796_v28 }
  0x2b   :  { %479 = vmatpush.bf16.msra.mxu1 %v804_v29 }
  0x2c   :  { %492 = vmatpush.bf16.msra.mxu2 %v812_v34 }
  0x2d   :  { %505 = vmatpush.bf16.msra.mxu3 %v820_v35  ;;  %467 = vmatmul.bf16.vlgmr.msra.gmra.mxu0 %v69_v36 }
  0x2e   :  { %511 = vmatpush.bf16.msrb.mxu0 %v835_v32  ;;  %480 = vmatmul.bf16.vlgmr.msra.gmra.mxu1 %v70_v37 }
  0x2f   :  { %524 = vmatpush.bf16.msrb.mxu1 %v843_v33  ;;  %493 = vmatmul.bf16.vlgmr.msra.gmra.mxu2 %v71_v42 }
  0x30   :  { %506 = vmatmul.bf16.vlgmr.msra.gmra.mxu3 %v72_v43 }
  0x32   :  { %512 = vmatpush.bf16.msrb.mxu0 %v834_v40  ;;  %v543_v40 = vld [vmem:[#allocation7 + $0x1] sm:$0x1] }
  0x33   :  { %525 = vmatpush.bf16.msrb.mxu1 %v842_v41 }
  0x36   :  { %513 = vmatpush.bf16.msrb.mxu0 %v833_v44  ;;  %v544_v44 = vld [vmem:[#allocation7 + $0x2] sm:$0x1] }
  0x37   :  { %526 = vmatpush.bf16.msrb.mxu1 %v841_v45 }
  0x3a   :  { %514 = vmatpush.bf16.msrb.mxu0 %v832_v46  ;;  %v545_v46 = vld [vmem:[#allocation7 + $0x3] sm:$0x1] }
  0x3b   :  { %527 = vmatpush.bf16.msrb.mxu1 %v840_v47 }
  0x3e   :  { %515 = vmatpush.bf16.msrb.mxu0 %v831_v48 }
  0x3f   :  { %528 = vmatpush.bf16.msrb.mxu1 %v839_v49 }
  0x42   :  { %516 = vmatpush.bf16.msrb.mxu0 %v830_v50 }
  0x43   :  { %529 = vmatpush.bf16.msrb.mxu1 %v838_v51 }
  0x46   :  { %517 = vmatpush.bf16.msrb.mxu0 %v829_v52 }
  0x47   :  { %530 = vmatpush.bf16.msrb.mxu1 %v837_v53  ;;  %v546_v53 = vld [vmem:[#allocation7 + $0x4] sm:$0x1] }
  0x4a   :  { %518 = vmatpush.bf16.msrb.mxu0 %v828_v54 }
  0x4b   :  { %531 = vmatpush.bf16.msrb.mxu1 %v836_v55 }
  0x4d   :  { %519 = vmatmul.bf16.vlgmr.msrb.gmra.mxu0 %v73_v58 }
  0x4e   :  { %532 = vmatmul.bf16.vlgmr.msrb.gmra.mxu1 %v74_v59 }
  0xaa   :  { %v468_v60 = vpop.f32.mrf.mxu0 }
  0xab   :  { %v481_v61 = vpop.f32.mrf.mxu1 }
  0xac   :  { %v482_v4 = vadd.f32 %v481_v61, %v468_v60 }
  0xb2   :  { %v470_v62 = vpop.f32.mrf.mxu0  ;;  %v494_v0 = vpop.f32.mrf.mxu2 }
  0xb3   :  { %v483_v63 = vpop.f32.mrf.mxu1  ;;  %v507_v1 = vpop.f32.mrf.mxu3  ;;  %v495_v5 = vadd.f32 %v494_v0, %v482_v4 }
  0xb5   :  { %v508_v6 = vadd.f32 %v507_v1, %v495_v5 }
  0xba   :  { %v496_v2 = vpop.f32.mrf.mxu2 }
  0xbb   :  { %v509_v3 = vpop.f32.mrf.mxu3 }
  0xca   :  { %v520_v7 = vpop.f32.mrf.mxu0 }
  0xcb   :  { %v533_v8 = vpop.f32.mrf.mxu1  ;;  %v521_v9 = vadd.f32 %v520_v7, %v508_v6 }
  0xcd   :  { %v534_v11 = vadd.f32 %v533_v8, %v521_v9 }
  0xcf   :  { %v549_v12 = vadd.f32 %v849_v10, %v534_v11 }
  0xd1   :  { %v550_v13 = vmax.f32 %v549_v12, 0.0 }
  0xd2   :  { %v522_v14 = vpop.f32.mrf.mxu0 }
  0xd3   :  { %v535_v15 = vpop.f32.mrf.mxu1  ;;  %v551_v16 = vrot.slane %v550_v13, 4  ;;  %v557_v17 = vmul.f32 %v550_v13, %v550_v13 }
  0xd5   :  { %v552_v18 = vadd.f32 %v551_v16, %v550_v13  ;;  %v558_v19 = vrot.slane %v557_v17, 4 }
  0xd7   :  { %v559_v20 = vadd.f32 %v558_v19, %v557_v17  ;;  %v553_v21 = vrot.slane %v552_v18, 2 }
  0xd9   :  { %v560_v22 = vrot.slane %v559_v20, 2  ;;  %v554_v23 = vadd.f32 %v553_v21, %v552_v18 }
  0xdb   :  { %v561_v24 = vadd.f32 %v560_v22, %v559_v20  ;;  %v555_v25 = vrot.slane %v554_v23, 1 }
  0xdd   :  { %v556_v26 = vadd.f32 %v555_v25, %v554_v23  ;;  %v562_v27 = vrot.slane %v561_v24, 1 }
  0xdf   :  { %v563_v28 = vadd.f32 %v562_v27, %v561_v24  ;;  %v564_v29 = vmul.f32 0.125, %v556_v26 }
  0xe1   :  { %v565_v30 = vmul.f32 0.125, %v563_v28  ;;  %v566_v31 = vmul.f32 %v564_v29, %v564_v29 }
  0xe3   :  { %v567_v32 = vsub.f32 %v565_v30, %v566_v31 }
  0xe5   :  { %v568_v33 = vmax.f32 %v567_v32, 0.0 }
  0xe7   :  { %v569_v34 = vadd.f32 1e-05, %v568_v33 }
  0xe9   :  { %850 = vrsqrt.f32 %v569_v34  ;;  %vm576_vm1 = vweird.f32 %v569_v34 }
  0xef   :  { %v851_v35 = vpop.eup %850 }
  0xf0   :  { %v571_v36 = vmul.f32 %v851_v35, %v569_v34  ;;  %vm577_vm0 = vweird.f32 %v851_v35 }
  0xf1   :  { %vm578_vm2 = vmor %vm576_vm1, %vm577_vm0 }
  0xf2   :  { %v572_v37 = vmul.f32 %v851_v35, %v571_v36 }
  0xf4   :  { %v573_v38 = vmul.f32 0.5, %v572_v37 }
  0xf6   :  { %v574_v39 = vsub.f32 1.5, %v573_v38 }
  0xf8   :  { %v575_v41 = vmul.f32 %v851_v35, %v574_v39 }
  0xfa   :  { %v579_v42 = vsel %vm578_vm2, %v851_v35, %v575_v41 }
  0xfb   :  { %v580_v43 = vmul.f32 %v579_v42, %v543_v40 }
  0xfd   :  { %v582_v45 = vmul.f32 %v580_v43, %v564_v29  ;;  %v581_v49 = vmul.f32 %v580_v43, %v545_v46 }
  0xff   :  { %v583_v47 = vsub.f32 %v544_v44, %v582_v45  ;;  %v590_v51 = vperm.slane %v581_v49, 0 }
 0x101   :  { %v584_v48 = vmul.f32 %v583_v47, %v545_v46  ;;  %v591_v52 = vmul.f32 %v590_v51, %v550_v13 }
 0x103   :  { %v586_v50 = vsel %vm585_vm3, %v584_v48, 0.0 }
 0x104   :  { %587 = vadd.xlane.f32.xlu0 %v586_v50 }
 0x10c   :  { %592 = vadd.xlane.f32.xlu0 %v591_v52 }
 0x177   :  { %v588_v54 = vpop.xlane.xlu0 %587 }
 0x178   :  { %v589_v55 = vadd.f32 %v588_v54, %v546_v53 }
 0x17a   :  { %v594_v56 = vperm.slane %v589_v55, 0 }
 0x17f   :  { %v593_v57 = vpop.xlane.xlu0 %592 }
 0x180   :  { %v595_v58 = vadd.f32 %v594_v56, %v593_v57 }
 0x182   :  { %597 = vst.msk [vmem:[%s968_s3] sm:$0xff] %vm596_vm4, %v595_v58 }
 0x183   :  { %602 = vsyncpa [#allocation4], 1 }
 0x184   :  { %603 = vsyncpa [#allocation6], 1 }

</bundles_post_ra>
